<compile_context>
chip_gen: v5e
topology: v5e:2x2
jax: 0.10.0
libtpu: 0.0.40
codegen_flags: <defaults>
</compile_context>

<pallas_src>
import functools

import jax
import jax.numpy as jnp
from jax.experimental import pallas as pl
from jax.experimental.pallas import tpu as pltpu


# Max batch-tile rows.  The (TB, 32) x block is lane-padded to 128 lanes in
# VMEM (4x raw) and double-buffered, and the f32 (H, TB) intermediate adds
# ~TB*H*4 bytes; at TB=8192 the total is ~12-14 MiB, inside the scoped VMEM
# budget on v5e (16 MiB default), v6e (32 MiB) and v7x (32-of-64 MiB).
_MAX_BLOCK_BATCH = 8192


def _mlp_kernel(x_ref, w1t_ref, b1_ref, w2t_ref, b2_ref, o_ref, *, compute_dtype):
    """One batch tile of sigmoid(tanh(x @ W1 + b1) @ W2 + b2), output transposed.

    x_ref   : (TB, I)   streamed per grid step
    w1t_ref : (H, I)    VMEM-resident across the grid (W1 transposed)
    b1_ref  : (H, 1)    resident
    w2t_ref : (O, H)    resident (W2 transposed)
    b2_ref  : (O, 1)    resident
    o_ref   : (O, TB)   batch on lanes -> lane-dense stores

    Layer 1 contracts I of (H, I) with I of (TB, I) so the hidden activations
    come out directly as (H, TB) (batch on lanes); layer 2 then contracts H
    with no relayout, producing the lane-dense (O, TB) output tile.
    """
    x = x_ref[...].astype(compute_dtype)

    # Layer 1 on the MXU with f32 accumulation; tanh on the EUP in f32.
    h = jnp.tanh(
        jax.lax.dot_general(
            w1t_ref[...].astype(compute_dtype),
            x,
            dimension_numbers=(((1,), (1,)), ((), ())),
            preferred_element_type=jnp.float32,
        )
        + b1_ref[...]
    )

    # Layer 2: (O, H) @ (H, TB) -> (O, TB), still lane-dense in the batch dim.
    y = jax.lax.dot_general(
        w2t_ref[...].astype(compute_dtype),
        h.astype(compute_dtype),
        dimension_numbers=(((1,), (0,)), ((), ())),
        preferred_element_type=jnp.float32,
    ) + b2_ref[...]

    o_ref[...] = jax.nn.sigmoid(y).astype(o_ref.dtype)


def _round_up(n, m):
    return ((n + m - 1) // m) * m


def neural_network_forward(x, w1, b1, w2, b2, *,
                           block_batch=4096, compute_dtype=jnp.float32):
    """x:(B,I), w1:(I,H), b1:(1,H) or (H,), w2:(H,O), b2:(1,O) or (O,).

    Returns squeeze(sigmoid(tanh(x @ W1 + b1) @ W2 + b2)), matching the torch
    module (squeeze drops ALL size-1 dims, incl. batch=1).
    """
    B, I = x.shape
    H = w1.shape[1]
    O = w2.shape[1]

    w1_t = w1.T                              # (H, I) resident
    b1_col = jnp.reshape(b1, (H, 1))         # broadcasts against (H, TB)
    w2_t = w2.T                              # (O, H) resident
    b2_col = jnp.reshape(b2, (O, 1))         # broadcasts against (O, TB)

    # --- batch tile selection -------------------------------------------------
    # Multiple of 128 so every output tile is lane-dense.  Prefer big tiles
    # (per-grid-step overhead dominates at these tiny layer sizes), but keep at
    # least 2 tiles when the padded batch spans more than one 128-row tile so
    # the "parallel" batch axis can use both TensorCores on v7x.
    block_batch = max(128, min(block_batch, _MAX_BLOCK_BATCH))
    tb_full = _round_up(B, 128)              # one tile covering the whole batch
    TB = min(_round_up(block_batch, 128), tb_full)
    if tb_full > 128:
        TB = min(TB, _round_up(pl.cdiv(B, 2), 128))
    B_pad = _round_up(B, TB)
    if B_pad != B:
        x = jnp.pad(x, ((0, B_pad - B), (0, 0)))
    grid = (B_pad // TB,)

    kernel = functools.partial(_mlp_kernel, compute_dtype=compute_dtype)

    x_bytes = x.dtype.itemsize
    cost = pl.CostEstimate(
        flops=2 * B_pad * I * H + 2 * B_pad * H * O,
        transcendentals=B_pad * H + B_pad * O,
        bytes_accessed=(x_bytes * B_pad * I
                        + 4 * (I * H + H + H * O + O + O * B_pad)),
    )

    out_t = pl.pallas_call(
        kernel,
        out_shape=jax.ShapeDtypeStruct((O, B_pad), jnp.float32),
        grid=grid,
        in_specs=[
            pl.BlockSpec((TB, I), lambda i: (i, 0)),   # x: streamed per tile
            pl.BlockSpec((H, I), lambda i: (0, 0)),    # W1^T: resident
            pl.BlockSpec((H, 1), lambda i: (0, 0)),    # b1: resident
            pl.BlockSpec((O, H), lambda i: (0, 0)),    # W2^T: resident
            pl.BlockSpec((O, 1), lambda i: (0, 0)),    # b2: resident
        ],
        out_specs=pl.BlockSpec((O, TB), lambda i: (0, i)),
        compiler_params=pltpu.CompilerParams(
            # batch tiles are independent -> shard across TCs on v7x megacore
            dimension_semantics=("parallel",),
            # explicit headroom for large tiles (<= physical VMEM on all gens)
            vmem_limit_bytes=32 * 1024 * 1024,
        ),
        cost_estimate=cost,
    )(x, w1_t, b1_col, w2_t, b2_col)

    # Avoid an extra XLA transpose over the (O, B_pad) output for O == 1.
    if O == 1:
        out = out_t[0, :B]                   # (B,)
    else:
        out = out_t[:, :B].T                 # (B, O)
    return jnp.squeeze(out)


def init_params(key, input_size, hidden_size, output_size):
    """Deterministic init mimicking nn.Linear's U(-1/sqrt(fan_in), +1/sqrt(fan_in))."""
    k1, k2, k3, k4 = jax.random.split(key, 4)
    bound1 = 1.0 / jnp.sqrt(input_size)
    bound2 = 1.0 / jnp.sqrt(hidden_size)
    w1 = jax.random.uniform(k1, (input_size, hidden_size), jnp.float32, -bound1, bound1)
    b1 = jax.random.uniform(k2, (1, hidden_size), jnp.float32, -bound1, bound1)
    w2 = jax.random.uniform(k3, (hidden_size, output_size), jnp.float32, -bound2, bound2)
    b2 = jax.random.uniform(k4, (1, output_size), jnp.float32, -bound2, bound2)
    return w1, b1, w2, b2


if __name__ == "__main__":
    input_size, hidden_size, output_size = 32, 64, 1

    key = jax.random.PRNGKey(0)
    kx, kp, kx2, kx3 = jax.random.split(key, 4)
    w1, b1, w2, b2 = init_params(kp, input_size, hidden_size, output_size)

    def ref_fwd(xx):
        return jax.nn.sigmoid(jnp.tanh(xx @ w1 + b1) @ w2 + b2).squeeze()

    # Small shape consistent with the module (batch=8): single padded tile.
    x_small = jax.random.normal(kx, (8, input_size), jnp.float32)
    out_small = jax.block_until_ready(
        neural_network_forward(x_small, w1, b1, w2, b2))
    ref_small = ref_fwd(x_small)
    assert out_small.shape == ref_small.shape == (8,)
    assert jnp.allclose(out_small, ref_small, atol=1e-5, rtol=1e-5)

    # Batch of 1024: split into 2 tiles of 512 rows so the parallel batch axis
    # can shard across both TensorCores on v7x.
    x_big = jax.random.normal(kx2, (1024, input_size), jnp.float32)
    out_big = jax.block_until_ready(
        neural_network_forward(x_big, w1, b1, w2, b2))
    ref_big = ref_fwd(x_big)
    assert out_big.shape == ref_big.shape == (1024,)
    assert jnp.allclose(out_big, ref_big, atol=1e-5, rtol=1e-5)

    # Ragged batch (3000 rows, 1024-row tiles): exercises padding + a 3-step
    # pipelined grid.
    x_ragged = jax.random.normal(kx3, (3000, input_size), jnp.float32)
    out_ragged = jax.block_until_ready(
        neural_network_forward(x_ragged, w1, b1, w2, b2, block_batch=1024))
    ref_ragged = ref_fwd(x_ragged)
    assert out_ragged.shape == ref_ragged.shape == (3000,)
    assert jnp.allclose(out_ragged, ref_ragged, atol=1e-5, rtol=1e-5)

    print("KERNEL_OK")
</pallas_src>

<mosaic_0001>
module attributes {stable_mosaic.version = 11 : i64} {
  func.func @_mlp_kernel(%arg0: i32, %arg1: memref<128x32xf32, #tpu.memory_space<vmem>>, %arg2: memref<64x32xf32, #tpu.memory_space<vmem>>, %arg3: memref<64x1xf32, #tpu.memory_space<vmem>>, %arg4: memref<1x64xf32, #tpu.memory_space<vmem>>, %arg5: memref<1x1xf32, #tpu.memory_space<vmem>>, %arg6: memref<1x128xf32, #tpu.memory_space<vmem>>) attributes {dimension_semantics = [#tpu.dimension_semantics<parallel>], iteration_bounds = array<i64: 1>, scalar_prefetch = 0 : i64, scratch_operands = 0 : i64, tpu.core_type = #tpu.core_type<tc>, window_params = [{transform_indices = @transform_0, window_bounds = array<i64: 128, 32>}, {pipeline_mode = #tpu.pipeline_mode<synchronous>, transform_indices = @transform_1, window_bounds = array<i64: 64, 32>}, {pipeline_mode = #tpu.pipeline_mode<synchronous>, transform_indices = @transform_2, window_bounds = array<i64: 64, 1>}, {pipeline_mode = #tpu.pipeline_mode<synchronous>, transform_indices = @transform_3, window_bounds = array<i64: 1, 64>}, {pipeline_mode = #tpu.pipeline_mode<synchronous>, transform_indices = @transform_4, window_bounds = array<i64: 1, 1>}, {transform_indices = @transform_5, window_bounds = array<i64: 1, 128>}]} {
    %c0 = arith.constant 0 : index
    %c0_0 = arith.constant 0 : index
    %0 = vector.load %arg1[%c0, %c0_0] : memref<128x32xf32, #tpu.memory_space<vmem>>, vector<128x32xf32>
    %c0_1 = arith.constant 0 : index
    %c0_2 = arith.constant 0 : index
    %1 = vector.load %arg2[%c0_1, %c0_2] : memref<64x32xf32, #tpu.memory_space<vmem>>, vector<64x32xf32>
    %cst = arith.constant dense<0.000000e+00> : vector<64x128xf32>
    %2 = tpu.matmul %1, %0, %cst {dimension_numbers = #tpu.dot_dimension_numbers<[1], [1], [0], [0], [0, 0, 1, 0], [], []>} : vector<64x32xf32>, vector<128x32xf32>, vector<64x128xf32> -> vector<64x128xf32>
    %c0_3 = arith.constant 0 : index
    %c0_4 = arith.constant 0 : index
    %3 = vector.load %arg3[%c0_3, %c0_4] : memref<64x1xf32, #tpu.memory_space<vmem>>, vector<64x1xf32>
    %4 = vector.broadcast %3 : vector<64x1xf32> to vector<64x128xf32>
    %5 = arith.addf %2, %4 : vector<64x128xf32>
    %6 = math.tanh %5 : vector<64x128xf32>
    %c0_5 = arith.constant 0 : index
    %c0_6 = arith.constant 0 : index
    %7 = vector.load %arg4[%c0_5, %c0_6] : memref<1x64xf32, #tpu.memory_space<vmem>>, vector<1x64xf32>
    %cst_7 = arith.constant dense<0.000000e+00> : vector<1x128xf32>
    %8 = tpu.matmul %7, %6, %cst_7 {dimension_numbers = #tpu.dot_dimension_numbers<[1], [0], [0], [1], [0, 0, 1, 1], [], []>} : vector<1x64xf32>, vector<64x128xf32>, vector<1x128xf32> -> vector<1x128xf32>
    %c0_8 = arith.constant 0 : index
    %c0_9 = arith.constant 0 : index
    %9 = vector.load %arg5[%c0_8, %c0_9] : memref<1x1xf32, #tpu.memory_space<vmem>>, vector<1x1xf32>
    %10 = vector.broadcast %9 : vector<1x1xf32> to vector<1x128xf32>
    %11 = arith.addf %8, %10 : vector<1x128xf32>
    %12 = arith.negf %11 : vector<1x128xf32>
    %13 = math.exp %12 : vector<1x128xf32>
    %cst_10 = arith.constant 1.000000e+00 : f32
    %14 = vector.broadcast %cst_10 : f32 to vector<1x128xf32>
    %15 = arith.addf %14, %13 : vector<1x128xf32>
    %16 = arith.divf %14, %15 : vector<1x128xf32>
    %c0_11 = arith.constant 0 : index
    %c0_12 = arith.constant 0 : index
    %17 = vector.load %arg6[%c0_11, %c0_12] : memref<1x128xf32, #tpu.memory_space<vmem>>, vector<1x128xf32>
    tpu.vector_store %arg6[%c0_11, %c0_12], %16 {strides = array<i32>} : memref<1x128xf32, #tpu.memory_space<vmem>>, vector<1x128xf32>,
    return
  }
  func.func @transform_0(%arg0: i32) -> (i32, i32) {
    %c0_i32 = arith.constant 0 : i32
    %c0_i32_0 = arith.constant 0 : i32
    return %arg0, %c0_i32 : i32, i32
  }
  func.func @transform_1(%arg0: i32) -> (i32, i32) {
    %c0_i32 = arith.constant 0 : i32
    %c0_i32_0 = arith.constant 0 : i32
    %c0_i32_1 = arith.constant 0 : i32
    return %c0_i32, %c0_i32_0 : i32, i32
  }
  func.func @transform_2(%arg0: i32) -> (i32, i32) {
    %c0_i32 = arith.constant 0 : i32
    %c0_i32_0 = arith.constant 0 : i32
    %c0_i32_1 = arith.constant 0 : i32
    return %c0_i32, %c0_i32_0 : i32, i32
  }
  func.func @transform_3(%arg0: i32) -> (i32, i32) {
    %c0_i32 = arith.constant 0 : i32
    %c0_i32_0 = arith.constant 0 : i32
    %c0_i32_1 = arith.constant 0 : i32
    return %c0_i32, %c0_i32_0 : i32, i32
  }
  func.func @transform_4(%arg0: i32) -> (i32, i32) {
    %c0_i32 = arith.constant 0 : i32
    %c0_i32_0 = arith.constant 0 : i32
    %c0_i32_1 = arith.constant 0 : i32
    return %c0_i32, %c0_i32_0 : i32, i32
  }
  func.func @transform_5(%arg0: i32) -> (i32, i32) {
    %c0_i32 = arith.constant 0 : i32
    %c0_i32_0 = arith.constant 0 : i32
    return %c0_i32, %arg0 : i32, i32
  }
}

</mosaic_0001>

<bundles_post_ra>
// kernel: tpu_custom_call.1
= control target key start
LH: loop header
LB: loop body
LE: loop exit
PB: predicated region body
PF: predicated region fallthrough
CT: control target
= control target key end

     0   :  { %s619_s0 = inlined_call_operand.vmem [shape: f32[128,32], index: 0, kind: input, shape index: {}]   ;;  %s620_s1 = inlined_call_operand.vmem [shape: f32[64,32], index: 1, kind: input, shape index: {}]   ;;  %s621_s2 = inlined_call_operand.vmem [shape: f32[64,1], index: 2, kind: input, shape index: {}]   ;;  %s622_s3 = inlined_call_operand.vmem [shape: f32[1,64], index: 3, kind: input, shape index: {}]   ;;  %s623_s4 = inlined_call_operand.<no memory space> [shape: f32[1,1], index: 4, kind: input, shape index: {}]   ;;  %s624_s5 = inlined_call_operand.hbm [shape: f32[1,128], index: 5, kind: output, shape index: {}]  }
   0x1   :  { %v10_v0 = vstv %s623_s4 }
   0x2   :  { %11 = vst [vmem:[#allocation2] sm:$0x1] %v10_v0 }
   0x3   :  { %v38_v1 = vld [vmem:[%s619_s0 + $0x78] sm:$0xff]  ;;  %vm95_vm0 = vcmask 261120   ;;  %v37_v2 = vld [vmem:[%s619_s0 + $0x70] sm:$0xff] }
   0x4   :  { %313 = vmatpush.xpose.msk.msra.mxu3 %vm95_vm0, %v38_v1  ;;  %285 = vmatpush.xpose.msk.msra.mxu0 %vm95_vm0, %v38_v1 }
   0x5   :  { %312 = vmatpush.xpose.msk.msra.mxu2 %vm95_vm0, %v38_v1  ;;  %311 = vmatpush.xpose.msk.msra.mxu1 %vm95_vm0, %v38_v1 }
   0x6   :  { %12 = vsyncpa [#allocation4], 0  ;;  %v36_v3 = vld [vmem:[%s619_s0 + $0x68] sm:$0xff]  ;;  %v35_v4 = vld [vmem:[%s619_s0 + $0x60] sm:$0xff]  ;;  %v410_v15 = vmov 0   ;;  %vm225_vm1 = vcmask 523264  }
   0x7   :  { %v34_v5 = vld [vmem:[%s619_s0 + $0x58] sm:$0xff]  ;;  %v33_v6 = vld [vmem:[%s619_s0 + $0x50] sm:$0xff]  ;;  %v32_v7 = vld [vmem:[%s619_s0 + $0x48] sm:$0xff]  ;;  %361 = vset.pattern.permute.xlu0 %v410_v15  ;;  %362 = vset.pattern.permute.xlu1 %v410_v15  ;;  %s276_s8 = sshll.u32 %s624_s5, 4  ;;  %s277_s8 = int_to_ptr.hbm [resolvable:$true] %s276_s8 }
   0x8   :  { %316 = vmatpush.xpose.msk.msra.mxu3 %vm95_vm0, %v37_v2  ;;  %286 = vmatpush.xpose.msk.msra.mxu0 %vm95_vm0, %v37_v2  ;;  %v31_v8 = vld [vmem:[%s619_s0 + $0x40] sm:$0xff]  ;;  %v30_v9 = vld [vmem:[%s619_s0 + $0x38] sm:$0xff]  ;;  %v29_v10 = vld [vmem:[%s619_s0 + $0x30] sm:$0xff] }
   0x9   :  { %315 = vmatpush.xpose.msk.msra.mxu2 %vm95_vm0, %v37_v2  ;;  %314 = vmatpush.xpose.msk.msra.mxu1 %vm95_vm0, %v37_v2  ;;  %v28_v11 = vld [vmem:[%s619_s0 + $0x28] sm:$0xff]  ;;  %v54_v12 = vld [vmem:[%s621_s2 + $0x38] sm:$0xff]  ;;  %v27_v14 = vld [vmem:[%s619_s0 + $0x20] sm:$0xff] }
   0xa   :  { %v52_v13 = vld [vmem:[%s621_s2 + $0x28] sm:$0xff]  ;;  %92 = vperm.xlu0 %361, %v54_v12   ;;  %v26_v16 = vld [vmem:[%s619_s0 + $0x18] sm:$0xff]  ;;  %363 = vset.pattern.permute.xlu2 %v410_v15  ;;  %v53_v17 = vld [vmem:[%s621_s2 + $0x30] sm:$0xff] }
   0xb   :  { %82 = vperm.xlu1 %362, %v52_v13   ;;  %v51_v18 = vld [vmem:[%s621_s2 + $0x20] sm:$0xff]  ;;  %v50_v19 = vld [vmem:[%s621_s2 + $0x18] sm:$0xff]  ;;  %v25_v20 = vld [vmem:[%s619_s0 + $0x10] sm:$0xff] }
   0xc   :  { %319 = vmatpush.xpose.msk.msra.mxu3 %vm95_vm0, %v36_v3  ;;  %287 = vmatpush.xpose.msk.msra.mxu0 %vm95_vm0, %v36_v3  ;;  %v24_v21 = vld [vmem:[%s619_s0 + $0x8] sm:$0xff]  ;;  %v49_v22 = vld [vmem:[%s621_s2 + $0x10] sm:$0xff]  ;;  %v47_v24 = vld [vmem:[%s621_s2] sm:$0xff] }
   0xd   :  { %318 = vmatpush.xpose.msk.msra.mxu2 %vm95_vm0, %v36_v3  ;;  %317 = vmatpush.xpose.msk.msra.mxu1 %vm95_vm0, %v36_v3  ;;  %v48_v23 = vld [vmem:[%s621_s2 + $0x8] sm:$0xff]  ;;  %v23_v25 = vld [vmem:[%s619_s0] sm:$0xff]  ;;  %v41_v29 = vld [vmem:[%s620_s1 + $0x10] sm:$0xff] }
   0xe   :  { %72 = vperm.xlu2 %363, %v50_v19   ;;  %v44_v26 = vld [vmem:[%s620_s1 + $0x28] sm:$0xff]  ;;  %v39_v27 = vld [vmem:[%s620_s1] sm:$0xff]  ;;  %v45_v31 = vld [vmem:[%s620_s1 + $0x30] sm:$0xff] }
   0xf   :  { %v43_v28 = vld [vmem:[%s620_s1 + $0x20] sm:$0xff]  ;;  %v40_v32 = vld [vmem:[%s620_s1 + $0x8] sm:$0xff]  ;;  %v42_v33 = vld [vmem:[%s620_s1 + $0x18] sm:$0xff] }
  0x10   :  { %322 = vmatpush.xpose.msk.msra.mxu3 %vm95_vm0, %v35_v4  ;;  %288 = vmatpush.xpose.msk.msra.mxu0 %vm95_vm0, %v35_v4  ;;  %v218_v30 = vld [vmem:[#allocation2] sm:$0x1]  ;;  %v46_v34 = vld [vmem:[%s620_s1 + $0x38] sm:$0xff] }
  0x11   :  { %321 = vmatpush.xpose.msk.msra.mxu2 %vm95_vm0, %v35_v4  ;;  %320 = vmatpush.xpose.msk.msra.mxu1 %vm95_vm0, %v35_v4  ;;  %v217_v2 = vld [vmem:[%s622_s3] sm:$0x1]  ;;  %s411_s3 = smov [#allocation3]  }
  0x12   :  { %87 = vperm.xlu0 %361, %v53_v17   ;;  %s274_s30 = sshll.u32 %s411_s3, 4  ;;  %s275_s30 = int_to_ptr.vmem [resolvable:$true] %s274_s30 }
  0x13   :  { %77 = vperm.xlu1 %362, %v51_v18  }
  0x14   :  { %325 = vmatpush.xpose.msk.msra.mxu3 %vm95_vm0, %v34_v5  ;;  %289 = vmatpush.xpose.msk.msra.mxu0 %vm95_vm0, %v34_v5 }
  0x15   :  { %324 = vmatpush.xpose.msk.msra.mxu2 %vm95_vm0, %v34_v5  ;;  %323 = vmatpush.xpose.msk.msra.mxu1 %vm95_vm0, %v34_v5 }
  0x16   :  { %67 = vperm.xlu2 %363, %v49_v22  }
  0x18   :  { %328 = vmatpush.xpose.msk.msra.mxu3 %vm95_vm0, %v33_v6  ;;  %290 = vmatpush.xpose.msk.msra.mxu0 %vm95_vm0, %v33_v6 }
  0x19   :  { %327 = vmatpush.xpose.msk.msra.mxu2 %vm95_vm0, %v33_v6  ;;  %326 = vmatpush.xpose.msk.msra.mxu1 %vm95_vm0, %v33_v6 }
  0x1a   :  { %62 = vperm.xlu0 %361, %v48_v23  }
  0x1b   :  { %57 = vperm.xlu1 %362, %v47_v24  }
  0x1c   :  { %331 = vmatpush.xpose.msk.msra.mxu3 %vm95_vm0, %v32_v7  ;;  %291 = vmatpush.xpose.msk.msra.mxu0 %vm95_vm0, %v32_v7 }
  0x1d   :  { %330 = vmatpush.xpose.msk.msra.mxu2 %vm95_vm0, %v32_v7  ;;  %329 = vmatpush.xpose.msk.msra.mxu1 %vm95_vm0, %v32_v7 }
  0x1e   :  { %221 = vperm.xlu2 %363, %v218_v30  }
  0x20   :  { %334 = vmatpush.xpose.msk.msra.mxu3 %vm95_vm0, %v31_v8  ;;  %292 = vmatpush.xpose.msk.msra.mxu0 %vm95_vm0, %v31_v8 }
  0x21   :  { %333 = vmatpush.xpose.msk.msra.mxu2 %vm95_vm0, %v31_v8  ;;  %332 = vmatpush.xpose.msk.msra.mxu1 %vm95_vm0, %v31_v8 }
  0x24   :  { %337 = vmatpush.xpose.msk.msra.mxu3 %vm95_vm0, %v30_v9  ;;  %293 = vmatpush.xpose.msk.msra.mxu0 %vm95_vm0, %v30_v9 }
  0x25   :  { %336 = vmatpush.xpose.msk.msra.mxu2 %vm95_vm0, %v30_v9  ;;  %335 = vmatpush.xpose.msk.msra.mxu1 %vm95_vm0, %v30_v9 }
  0x28   :  { %340 = vmatpush.xpose.msk.msra.mxu3 %vm95_vm0, %v29_v10  ;;  %294 = vmatpush.xpose.msk.msra.mxu0 %vm95_vm0, %v29_v10 }
  0x29   :  { %339 = vmatpush.xpose.msk.msra.mxu2 %vm95_vm0, %v29_v10  ;;  %338 = vmatpush.xpose.msk.msra.mxu1 %vm95_vm0, %v29_v10 }
  0x2c   :  { %343 = vmatpush.xpose.msk.msra.mxu3 %vm95_vm0, %v28_v11  ;;  %295 = vmatpush.xpose.msk.msra.mxu0 %vm95_vm0, %v28_v11 }
  0x2d   :  { %342 = vmatpush.xpose.msk.msra.mxu2 %vm95_vm0, %v28_v11  ;;  %341 = vmatpush.xpose.msk.msra.mxu1 %vm95_vm0, %v28_v11 }
  0x30   :  { %346 = vmatpush.xpose.msk.msra.mxu3 %vm95_vm0, %v27_v14  ;;  %296 = vmatpush.xpose.msk.msra.mxu0 %vm95_vm0, %v27_v14 }
  0x31   :  { %345 = vmatpush.xpose.msk.msra.mxu2 %vm95_vm0, %v27_v14  ;;  %344 = vmatpush.xpose.msk.msra.mxu1 %vm95_vm0, %v27_v14 }
  0x34   :  { %349 = vmatpush.xpose.msk.msra.mxu3 %vm95_vm0, %v26_v16  ;;  %297 = vmatpush.xpose.msk.msra.mxu0 %vm95_vm0, %v26_v16 }
  0x35   :  { %348 = vmatpush.xpose.msk.msra.mxu2 %vm95_vm0, %v26_v16  ;;  %347 = vmatpush.xpose.msk.msra.mxu1 %vm95_vm0, %v26_v16 }
  0x38   :  { %352 = vmatpush.xpose.msk.msra.mxu3 %vm95_vm0, %v25_v20  ;;  %298 = vmatpush.xpose.msk.msra.mxu0 %vm95_vm0, %v25_v20 }
  0x39   :  { %351 = vmatpush.xpose.msk.msra.mxu2 %vm95_vm0, %v25_v20  ;;  %350 = vmatpush.xpose.msk.msra.mxu1 %vm95_vm0, %v25_v20 }
  0x3c   :  { %355 = vmatpush.xpose.msk.msra.mxu3 %vm95_vm0, %v24_v21  ;;  %299 = vmatpush.xpose.msk.msra.mxu0 %vm95_vm0, %v24_v21 }
  0x3d   :  { %354 = vmatpush.xpose.msk.msra.mxu2 %vm95_vm0, %v24_v21  ;;  %353 = vmatpush.xpose.msk.msra.mxu1 %vm95_vm0, %v24_v21 }
  0x40   :  { %358 = vmatpush.xpose.msk.msra.mxu3 %vm95_vm0, %v23_v25  ;;  %300 = vmatpush.xpose.msk.msra.mxu0 %vm95_vm0, %v23_v25 }
  0x41   :  { %357 = vmatpush.xpose.msk.msra.mxu2 %vm95_vm0, %v23_v25  ;;  %356 = vmatpush.xpose.msk.msra.mxu1 %vm95_vm0, %v23_v25 }
  0x43   :  { %306 = vmatmul.msk.f32.vlgmr.msra.gmra.mxu3 %vm95_vm0, %v44_v26  ;;  %301 = vmatmul.msk.f32.vlgmr.msra.gmra.mxu0 %vm95_vm0, %v39_v27 }
  0x44   :  { %305 = vmatmul.msk.f32.vlgmr.msra.gmra.mxu2 %vm95_vm0, %v43_v28  ;;  %303 = vmatmul.msk.f32.vlgmr.msra.gmra.mxu1 %vm95_vm0, %v41_v29 }
  0x4b   :  { %307 = vmatmul.msk.f32.gmra.mxu3 %vm95_vm0, %v45_v31  ;;  %302 = vmatmul.msk.f32.gmra.mxu0 %vm95_vm0, %v40_v32 }
  0x4c   :  { %304 = vmatmul.msk.f32.gmra.mxu1 %vm95_vm0, %v42_v33 }
  0x53   :  { %308 = vmatmul.msk.f32.gmra.mxu3 %vm95_vm0, %v46_v34 }
  0x68   :  { %v73_v40 = vpop.permute.xlu2 %72 }
  0x70   :  { %v68_v51 = vpop.permute.xlu2 %67 }
  0x78   :  { %v222_v4 = vpop.permute.xlu2 %221 }
  0x79   :  { %v224_v5 = vperm.slane %v222_v4, 0 }
  0x7c   :  { %v93_v36 = vpop.permute.xlu0 %92 }
  0x7d   :  { %v83_v37 = vpop.permute.xlu1 %82 }
  0x84   :  { %v88_v41 = vpop.permute.xlu0 %87 }
  0x85   :  { %v78_v43 = vpop.permute.xlu1 %77 }
  0x8c   :  { %v63_v53 = vpop.permute.xlu0 %62 }
  0x8d   :  { %v58_v57 = vpop.permute.xlu1 %57 }
  0xc0   :  { %v185_v42 = vpop.f32.mrf.mxu0 }
  0xc1   :  { %v191_v39 = vpop.f32.mrf.mxu1  ;;  %v186_v61 = vadd.f32 %v185_v42, %v58_v57 }
  0xc2   :  { %v192_v56 = vadd.f32 %v191_v39, %v68_v51 }
  0xc6   :  { %v200_v35 = vpop.f32.mrf.mxu3 }
  0xc7   :  { %v197_v47 = vpop.f32.mrf.mxu2  ;;  %v201_v48 = vadd.f32 %v200_v35, %v83_v37 }
  0xc8   :  { %v198_v50 = vadd.f32 %v197_v47, %v78_v43  ;;  %v188_v54 = vpop.f32.mrf.mxu0 }
  0xc9   :  { %v194_v49 = vpop.f32.mrf.mxu1  ;;  %v189_v59 = vadd.f32 %v188_v54, %v63_v53 }
  0xca   :  { %v195_v52 = vadd.f32 %v194_v49, %v73_v40 }
  0xce   :  { %v203_v38 = vpop.f32.mrf.mxu3 }
  0xcf   :  { %v204_v45 = vadd.f32 %v203_v38, %v88_v41 }
  0xd6   :  { %v206_v44 = vpop.f32.mrf.mxu3 }
  0xd7   :  { %v207_v46 = vadd.f32 %v206_v44, %v93_v36 }
  0xd9   :  { %364 = vtanh.f32 %v207_v46 }
  0xda   :  { %366 = vtanh.f32 %v204_v45 }
  0xdb   :  { %368 = vtanh.f32 %v201_v48 }
  0xdc   :  { %370 = vtanh.f32 %v198_v50 }
  0xdd   :  { %372 = vtanh.f32 %v195_v52 }
  0xde   :  { %374 = vtanh.f32 %v192_v56 }
  0xdf   :  { %v365_v55 = vpop.eup %364  ;;  %376 = vtanh.f32 %v189_v59 }
  0xe0   :  { %237 = vmatpush.msrb.mxu1 %v365_v55  ;;  %v367_v58 = vpop.eup %366  ;;  %378 = vtanh.f32 %v186_v61 }
  0xe1   :  { %v369_v60 = vpop.eup %368 }
  0xe2   :  { %238 = vmatpush.msrb.mxu1 %v367_v58  ;;  %v371_v62 = vpop.eup %370 }
  0xe3   :  { %v373_v63 = vpop.eup %372 }
  0xe4   :  { %239 = vmatpush.msrb.mxu1 %v369_v60  ;;  %v375_v0 = vpop.eup %374 }
  0xe5   :  { %v377_v1 = vpop.eup %376 }
  0xe6   :  { %240 = vmatpush.msrb.mxu1 %v371_v62  ;;  %v379_v3 = vpop.eup %378 }
  0xe8   :  { %241 = vmatpush.msrb.mxu1 %v373_v63 }
  0xea   :  { %242 = vmatpush.msrb.mxu1 %v375_v0 }
  0xec   :  { %243 = vmatpush.msrb.mxu1 %v377_v1 }
  0xee   :  { %244 = vmatpush.msrb.mxu1 %v379_v3 }
  0xef   :  { %309 = vmatmul.msk.f32.vlgmr.msrb.gmra.mxu1 %vm225_vm1, %v217_v2 }
 0x16c   :  { %v246_v6 = vpop.f32.mrf.mxu1 }
 0x16d   :  { %v247_v7 = vadd.f32 %v246_v6, %v224_v5 }
 0x16f   :  { %v310_v8 = vmul.f32 -1.442695, %v247_v7 }
 0x171   :  { %380 = vpow2.f32 %v310_v8 }
 0x177   :  { %v381_v9 = vpop.eup %380 }
 0x178   :  { %v252_v10 = vadd.f32 1.0, %v381_v9 }
 0x17a   :  { %382 = vrcp.f32 %v252_v10  ;;  %v264_v14 = vand.u32 2147483648, %v252_v10  ;;  %v262_v16 = vand.u32 2147483647, %v252_v10  ;;  %vm258_vm3 = vweird.f32 %v252_v10 }
 0x17c   :  { %v265_v18 = vor.u32 1.1754944e-38, %v264_v14  ;;  %vm263_vm5 = vcmp.eq.f32.partialorder %v262_v16, 8.507059e+37 }
 0x180   :  { %v383_v11 = vpop.eup %382 }
 0x181   :  { %v254_v12 = vmul.f32 %v383_v11, %v252_v10  ;;  %vm259_vm2 = vweird.f32 %v383_v11 }
 0x182   :  { %vm260_vm4 = vmor %vm258_vm3, %vm259_vm2 }
 0x183   :  { %v255_v13 = vsub.f32 1.0, %v254_v12 }
 0x185   :  { %v256_v15 = vmul.f32 %v383_v11, %v255_v13 }
 0x187   :  { %v257_v17 = vadd.f32 %v383_v11, %v256_v15 }
 0x189   :  { %v261_v19 = vsel %vm260_vm4, %v383_v11, %v257_v17 }
 0x18a   :  { %v266_v20 = vsel %vm263_vm5, %v265_v18, %v261_v19 }
 0x18b   :  { %268 = vst [vmem:[#allocation3] sm:$0x1] %v266_v20 }
 0x18c   :  { %279 = dma.vmem_to_hbm [thread:$0]  %s275_s30, 16, %s277_s8, [#allocation4]  }
 0x18d   :  { %408 = dma.done.wait [#allocation4], 16  }
 0x18e   :  { %409 = vsyncadd [#allocation4], 4294967280 }
 0x18f   :  { %284 = vsyncpa [#allocation4], 1 }

</bundles_post_ra>
